<compile_context>
chip_gen: v5e
topology: v5e:2x2
jax: 0.10.0
libtpu: 0.0.40
codegen_flags: <defaults>
</compile_context>

<pallas_src>
import functools

import jax
import jax.numpy as jnp
from jax.experimental import pallas as pl
from jax.experimental.pallas import tpu as pltpu

_LANE = 128     # lane width (last dim)
_SUBLANE = 8    # f32 sublane count (second-to-last dim)


def _round_up(n, m):
    return ((n + m - 1) // m) * m


def _apply_activation(y, activation):
    """f32 epilogue activation. y is the f32 (bias-added) matmul result."""
    if activation is None:
        return y
    if activation == "tanh":
        return jnp.tanh(y)
    if activation == "relu":
        return jnp.maximum(y, 0.0)
    if activation == "sigmoid":
        # exp and reciprocal both run on the EUP slot (otherwise idle).
        return pl.reciprocal(1.0 + jnp.exp(-y), approx=True)
    raise ValueError(f"unsupported activation: {activation!r}")


def _mlp_fused_kernel(*refs, num_layers, hidden_activation, output_activation,
                      compute_dtype):
    """refs = (x, w0, b0, w1, b1, ..., out). Whole MLP in one kernel body.

    Weights arrive already cast to `compute_dtype` (done once, outside);
    only the activation is cast in-kernel. Accumulation and the bias +
    activation epilogue stay in f32.
    """
    x_ref = refs[0]
    o_ref = refs[-1]
    wb_refs = refs[1:-1]

    x = x_ref[...]
    if compute_dtype is not None:
        x = x.astype(compute_dtype)

    for li in range(num_layers):
        w = wb_refs[2 * li][...]               # already compute_dtype
        b = wb_refs[2 * li + 1][...]           # (1, OUTp) f32
        y = jnp.dot(x, w, preferred_element_type=jnp.float32)
        y = y + b
        act = hidden_activation if li < num_layers - 1 else output_activation
        y = _apply_activation(y, act)
        if compute_dtype is not None and li < num_layers - 1:
            y = y.astype(compute_dtype)        # carry hidden activations narrow
        x = y

    o_ref[...] = x.astype(o_ref.dtype)


def init_mlp_params(key, layer_sizes):
    """Deterministic params matching nn.Linear shapes (bias zero-init).

    Weight stored transposed as (in, out) for the kernel; bias is (out,).
    """
    params = []
    for n_in, n_out in zip(layer_sizes[:-1], layer_sizes[1:]):
        key, sub = jax.random.split(key)
        bound = 1.0 / jnp.sqrt(jnp.float32(n_in))
        w = jax.random.uniform(
            sub, (n_in, n_out), dtype=jnp.float32, minval=-bound, maxval=bound)
        b = jnp.zeros((n_out,), dtype=jnp.float32)   # nn.init.zeros_(bias)
        params.append((w, b))
    return params


class PallasMLP:
    """Reproduces MLP.forward with one fused Pallas kernel; params padded once."""

    def __init__(self, params, *, hidden_activation="tanh",
                 output_activation=None, output_squeeze=False,
                 matmul_dtype=jnp.bfloat16, max_batch_tile=512,
                 vmem_budget_bytes=24 << 20):
        self.num_layers = len(params)
        self.in_dim = int(params[0][0].shape[0])
        self.out_dim = int(params[-1][0].shape[1])
        self.out_p = _round_up(self.out_dim, _LANE)
        self.hidden_activation = hidden_activation
        self.output_activation = output_activation
        self.output_squeeze = output_squeeze
        self.matmul_dtype = matmul_dtype
        self.max_batch_tile = max_batch_tile
        self.vmem_budget_bytes = vmem_budget_bytes

        # ---- Pad (+cast) every weight/bias ONCE; reused across all calls. ----
        wdt = jnp.float32 if matmul_dtype is None else matmul_dtype
        flat = []
        prev_p = self.in_dim          # first-layer K == unpadded input features
        self._max_feat_p = max(self.out_p, _LANE)
        for w, b in params:
            n_in, n_out = int(w.shape[0]), int(w.shape[1])
            n_out_p = _round_up(n_out, _LANE)
            w_p = jnp.zeros((prev_p, n_out_p), wdt).at[:n_in, :n_out].set(
                w.astype(wdt))
            b_p = jnp.zeros((1, n_out_p), jnp.float32).at[:, :n_out].set(
                jnp.reshape(b, (1, -1)).astype(jnp.float32))
            flat += [w_p, b_p]
            prev_p = n_out_p
            self._max_feat_p = max(self._max_feat_p, n_out_p)
        self._flat_wb = flat
        self._weight_bytes = sum(int(a.size) * a.dtype.itemsize for a in flat)

        self._kernel = functools.partial(
            _mlp_fused_kernel,
            num_layers=self.num_layers,
            hidden_activation=hidden_activation,
            output_activation=output_activation,
            compute_dtype=matmul_dtype,
        )

    # ------------------------------------------------------------------ #
    def _pick_batch_tile(self, B, x_itemsize):
        """Largest row tile that fits the VMEM budget; keep >=2 grid steps for v7x."""
        def est(t):
            io = 2 * t * (self.in_dim * x_itemsize + self.out_p * 4)  # dbl-buffered tiles
            act = 2 * t * self._max_feat_p * 4                        # live intermediates
            return 2 * self._weight_bytes + io + act                  # resident weights (x2)

        tb = self.max_batch_tile
        while tb > _SUBLANE and est(tb) > self.vmem_budget_bytes:
            tb //= 2
        # TODO(synk): if padded weights alone exceed ~half of v7x's 64 MiB VMEM,
        # fall back to a per-layer / K-tiled pipeline instead of all-resident.
        if B <= tb:
            if B > 2 * _LANE:
                tb = _round_up(pl.cdiv(B, 2), _SUBLANE)   # >=2 steps -> both v7x TCs
            else:
                tb = _round_up(max(B, 1), _SUBLANE)        # single sublane-aligned block
        return tb, est(tb)

    # ------------------------------------------------------------------ #
    def __call__(self, x):
        added_batch = False
        if x.ndim == 1:                     # nn.Linear also accepts 1-D input
            x = x[None, :]
            added_batch = True
        assert x.ndim == 2 and x.shape[1] == self.in_dim
        B = x.shape[0]

        tb, est = self._pick_batch_tile(B, x.dtype.itemsize)
        grid = (pl.cdiv(B, tb),)
        vmem_limit = int(max(32 << 20, min(2 * est + (4 << 20), 56 << 20)))

        in_specs = [pl.BlockSpec((tb, self.in_dim), lambda i: (i, 0))]
        for a in self._flat_wb:
            # Constant-index resident blocks: Pallas skips re-DMA across steps.
            in_specs.append(pl.BlockSpec(a.shape, lambda i: (0, 0)))

        y_p = pl.pallas_call(
            self._kernel,
            out_shape=jax.ShapeDtypeStruct((B, self.out_p), x.dtype),
            grid=grid,
            in_specs=in_specs,
            out_specs=pl.BlockSpec((tb, self.out_p), lambda i: (i, 0)),
            compiler_params=pltpu.CompilerParams(
                dimension_semantics=("parallel",),
                vmem_limit_bytes=vmem_limit),
        )(x, *self._flat_wb)

        y = y_p[:, :self.out_dim]
        if added_batch:
            y = y[0]
        # torch .squeeze() removes ALL size-1 dims (incl. batch when B==1);
        # jnp.squeeze matches that behaviour exactly.
        return jnp.squeeze(y) if self.output_squeeze else y


# ---------------------------------------------------------------------- #
def _reference_forward(params, x):
    ref = x
    for w, b in params[:-1]:
        ref = jnp.tanh(ref @ w + b)
    w, b = params[-1]
    return ref @ w + b


if __name__ == "__main__":
    key = jax.random.PRNGKey(0)
    key, xk, xk_big = jax.random.split(key, 3)

    # layers = [obs_dim, hidden, hidden, out_dim]
    layer_sizes = [16, 32, 32, 4]
    params = init_mlp_params(key, layer_sizes)

    x_small = jax.random.normal(xk, (2, layer_sizes[0]), dtype=jnp.float32)
    x_large = jax.random.normal(xk_big, (1037, layer_sizes[0]), dtype=jnp.float32)

    # f32 MXU-operand path (tight numerics check).
    mlp_f32 = PallasMLP(params, matmul_dtype=None)
    # default bf16 MXU-operand path (f32 accumulate + epilogue).
    mlp_bf16 = PallasMLP(params)

    # Small batch (single block path).
    out_f32 = jax.block_until_ready(mlp_f32(x_small))
    out_bf16 = jax.block_until_ready(mlp_bf16(x_small))
    ref_small = _reference_forward(params, x_small)
    assert out_f32.shape == (2, layer_sizes[-1])
    assert jnp.allclose(out_f32, ref_small, atol=1e-4, rtol=1e-4), float(
        jnp.max(jnp.abs(out_f32 - ref_small)))
    assert jnp.allclose(out_bf16, ref_small, atol=5e-2, rtol=5e-2), float(
        jnp.max(jnp.abs(out_bf16 - ref_small)))

    # Large ragged batch (tiled "parallel" grid, partial last block masked).
    out_big_f32 = jax.block_until_ready(mlp_f32(x_large))
    out_big_bf16 = jax.block_until_ready(mlp_bf16(x_large))
    ref_big = _reference_forward(params, x_large)
    assert out_big_f32.shape == (1037, layer_sizes[-1])
    assert jnp.allclose(out_big_f32, ref_big, atol=1e-4, rtol=1e-4), float(
        jnp.max(jnp.abs(out_big_f32 - ref_big)))
    assert jnp.allclose(out_big_bf16, ref_big, atol=5e-2, rtol=5e-2), float(
        jnp.max(jnp.abs(out_big_bf16 - ref_big)))

    print("KERNEL_OK")
</pallas_src>

<mosaic_0001>
module attributes {stable_mosaic.version = 11 : i64} {
  func.func @_mlp_fused_kernel(%arg0: i32, %arg1: memref<8x16xf32, #tpu.memory_space<vmem>>, %arg2: memref<16x128xf32, #tpu.memory_space<vmem>>, %arg3: memref<1x128xf32, #tpu.memory_space<vmem>>, %arg4: memref<128x128xf32, #tpu.memory_space<vmem>>, %arg5: memref<1x128xf32, #tpu.memory_space<vmem>>, %arg6: memref<128x128xf32, #tpu.memory_space<vmem>>, %arg7: memref<1x128xf32, #tpu.memory_space<vmem>>, %arg8: memref<8x128xf32, #tpu.memory_space<vmem>>) attributes {dimension_semantics = [#tpu.dimension_semantics<parallel>], iteration_bounds = array<i64: 1>, scalar_prefetch = 0 : i64, scratch_operands = 0 : i64, tpu.core_type = #tpu.core_type<tc>, window_params = [{transform_indices = @transform_0, window_bounds = array<i64: 8, 16>}, {pipeline_mode = #tpu.pipeline_mode<synchronous>, transform_indices = @transform_1, window_bounds = array<i64: 16, 128>}, {pipeline_mode = #tpu.pipeline_mode<synchronous>, transform_indices = @transform_2, window_bounds = array<i64: 1, 128>}, {pipeline_mode = #tpu.pipeline_mode<synchronous>, transform_indices = @transform_3, window_bounds = array<i64: 128, 128>}, {pipeline_mode = #tpu.pipeline_mode<synchronous>, transform_indices = @transform_4, window_bounds = array<i64: 1, 128>}, {pipeline_mode = #tpu.pipeline_mode<synchronous>, transform_indices = @transform_5, window_bounds = array<i64: 128, 128>}, {pipeline_mode = #tpu.pipeline_mode<synchronous>, transform_indices = @transform_6, window_bounds = array<i64: 1, 128>}, {transform_indices = @transform_7, window_bounds = array<i64: 8, 128>}]} {
    %c0 = arith.constant 0 : index
    %c0_0 = arith.constant 0 : index
    %0 = vector.load %arg1[%c0, %c0_0] : memref<8x16xf32, #tpu.memory_space<vmem>>, vector<8x16xf32>
    %c0_1 = arith.constant 0 : index
    %c0_2 = arith.constant 0 : index
    %1 = vector.load %arg2[%c0_1, %c0_2] : memref<16x128xf32, #tpu.memory_space<vmem>>, vector<16x128xf32>
    %c0_3 = arith.constant 0 : index
    %c0_4 = arith.constant 0 : index
    %2 = vector.load %arg3[%c0_3, %c0_4] : memref<1x128xf32, #tpu.memory_space<vmem>>, vector<1x128xf32>
    %cst = arith.constant dense<0.000000e+00> : vector<8x128xf32>
    %3 = tpu.matmul %0, %1, %cst {dimension_numbers = #tpu.dot_dimension_numbers<[1], [0], [0], [1], [0, 0, 1, 1], [], []>} : vector<8x16xf32>, vector<16x128xf32>, vector<8x128xf32> -> vector<8x128xf32>
    %4 = vector.broadcast %2 : vector<1x128xf32> to vector<8x128xf32>
    %5 = arith.addf %3, %4 : vector<8x128xf32>
    %6 = math.tanh %5 : vector<8x128xf32>
    %c0_5 = arith.constant 0 : index
    %c0_6 = arith.constant 0 : index
    %7 = vector.load %arg4[%c0_5, %c0_6] : memref<128x128xf32, #tpu.memory_space<vmem>>, vector<128x128xf32>
    %c0_7 = arith.constant 0 : index
    %c0_8 = arith.constant 0 : index
    %8 = vector.load %arg5[%c0_7, %c0_8] : memref<1x128xf32, #tpu.memory_space<vmem>>, vector<1x128xf32>
    %cst_9 = arith.constant dense<0.000000e+00> : vector<8x128xf32>
    %9 = tpu.matmul %6, %7, %cst_9 {dimension_numbers = #tpu.dot_dimension_numbers<[1], [0], [0], [1], [0, 0, 1, 1], [], []>} : vector<8x128xf32>, vector<128x128xf32>, vector<8x128xf32> -> vector<8x128xf32>
    %10 = vector.broadcast %8 : vector<1x128xf32> to vector<8x128xf32>
    %11 = arith.addf %9, %10 : vector<8x128xf32>
    %12 = math.tanh %11 : vector<8x128xf32>
    %c0_10 = arith.constant 0 : index
    %c0_11 = arith.constant 0 : index
    %13 = vector.load %arg6[%c0_10, %c0_11] : memref<128x128xf32, #tpu.memory_space<vmem>>, vector<128x128xf32>
    %c0_12 = arith.constant 0 : index
    %c0_13 = arith.constant 0 : index
    %14 = vector.load %arg7[%c0_12, %c0_13] : memref<1x128xf32, #tpu.memory_space<vmem>>, vector<1x128xf32>
    %cst_14 = arith.constant dense<0.000000e+00> : vector<8x128xf32>
    %15 = tpu.matmul %12, %13, %cst_14 {dimension_numbers = #tpu.dot_dimension_numbers<[1], [0], [0], [1], [0, 0, 1, 1], [], []>} : vector<8x128xf32>, vector<128x128xf32>, vector<8x128xf32> -> vector<8x128xf32>
    %16 = vector.broadcast %14 : vector<1x128xf32> to vector<8x128xf32>
    %17 = arith.addf %15, %16 : vector<8x128xf32>
    %c0_15 = arith.constant 0 : index
    %c0_16 = arith.constant 0 : index
    %18 = vector.load %arg8[%c0_15, %c0_16] : memref<8x128xf32, #tpu.memory_space<vmem>>, vector<8x128xf32>
    tpu.vector_store %arg8[%c0_15, %c0_16], %17 {strides = array<i32>} : memref<8x128xf32, #tpu.memory_space<vmem>>, vector<8x128xf32>,
    return
  }
  func.func @transform_0(%arg0: i32) -> (i32, i32) {
    %c0_i32 = arith.constant 0 : i32
    %c0_i32_0 = arith.constant 0 : i32
    return %arg0, %c0_i32 : i32, i32
  }
  func.func @transform_1(%arg0: i32) -> (i32, i32) {
    %c0_i32 = arith.constant 0 : i32
    %c0_i32_0 = arith.constant 0 : i32
    %c0_i32_1 = arith.constant 0 : i32
    return %c0_i32, %c0_i32_0 : i32, i32
  }
  func.func @transform_2(%arg0: i32) -> (i32, i32) {
    %c0_i32 = arith.constant 0 : i32
    %c0_i32_0 = arith.constant 0 : i32
    %c0_i32_1 = arith.constant 0 : i32
    return %c0_i32, %c0_i32_0 : i32, i32
  }
  func.func @transform_3(%arg0: i32) -> (i32, i32) {
    %c0_i32 = arith.constant 0 : i32
    %c0_i32_0 = arith.constant 0 : i32
    %c0_i32_1 = arith.constant 0 : i32
    return %c0_i32, %c0_i32_0 : i32, i32
  }
  func.func @transform_4(%arg0: i32) -> (i32, i32) {
    %c0_i32 = arith.constant 0 : i32
    %c0_i32_0 = arith.constant 0 : i32
    %c0_i32_1 = arith.constant 0 : i32
    return %c0_i32, %c0_i32_0 : i32, i32
  }
  func.func @transform_5(%arg0: i32) -> (i32, i32) {
    %c0_i32 = arith.constant 0 : i32
    %c0_i32_0 = arith.constant 0 : i32
    %c0_i32_1 = arith.constant 0 : i32
    return %c0_i32, %c0_i32_0 : i32, i32
  }
  func.func @transform_6(%arg0: i32) -> (i32, i32) {
    %c0_i32 = arith.constant 0 : i32
    %c0_i32_0 = arith.constant 0 : i32
    %c0_i32_1 = arith.constant 0 : i32
    return %c0_i32, %c0_i32_0 : i32, i32
  }
  func.func @transform_7(%arg0: i32) -> (i32, i32) {
    %c0_i32 = arith.constant 0 : i32
    %c0_i32_0 = arith.constant 0 : i32
    return %arg0, %c0_i32 : i32, i32
  }
}

</mosaic_0001>

<bundles_post_ra>
// kernel: tpu_custom_call.1
= control target key start
LH: loop header
LB: loop body
LE: loop exit
PB: predicated region body
PF: predicated region fallthrough
CT: control target
= control target key end

     0   :  { %12 = vsyncpa [#allocation3], 0  ;;  %s449_s0 = inlined_call_operand.hbm [shape: f32[2,16], index: 0, kind: input, shape index: {}]   ;;  %s450_s1 = inlined_call_operand.hbm [shape: f32[16,128], index: 1, kind: input, shape index: {}]   ;;  %s451_s2 = inlined_call_operand.vmem [shape: f32[1,128], index: 2, kind: input, shape index: {}]   ;;  %s452_s3 = inlined_call_operand.hbm [shape: f32[128,128], index: 3, kind: input, shape index: {}]   ;;  %s453_s4 = inlined_call_operand.vmem [shape: f32[1,128], index: 4, kind: input, shape index: {}]   ;;  %s454_s5 = inlined_call_operand.hbm [shape: f32[128,128], index: 5, kind: input, shape index: {}]   ;;  %s455_s6 = inlined_call_operand.vmem [shape: f32[1,128], index: 6, kind: input, shape index: {}]   ;;  %s456_s7 = inlined_call_operand.hbm [shape: f32[2,128], index: 7, kind: output, shape index: {}]  }
   0x1   :  { %13 = vsyncpa [#allocation6], 0 }
   0x2   :  { %14 = vsyncpa [#allocation9], 0 }
   0x3   :  { %15 = vsyncpa [#allocation4], 0  ;;  %s33_s26 = sshll.u32 %s450_s1, 4  ;;  %s34_s26 = int_to_ptr.hbm [resolvable:$true] %s33_s26 }
   0x4   :  { %19 = vsyncadd [#allocation3], 96  ;;  %s370_s27 = smov [#allocation5]   ;;  %s20_s8 = sshll.u32 %s449_s0, 4  ;;  %s21_s8 = int_to_ptr.hbm [resolvable:$true] %s20_s8 }
   0x5   :  { %s35_s28 = sshll.u32 %s370_s27, 4  ;;  %s371_s9 = smov 128   ;;  %s36_s28 = int_to_ptr.vmem [resolvable:$true] %s35_s28 }
   0x6   :  { %s372_s10 = smov 8   ;;  %s373_s11 = smov [#allocation2]  }
   0x7   :  { %41 = dma.hbm_to_vmem [thread:$0]  %s34_s26, 256, %s36_s28, [#allocation6], %s371_s9, %s371_s9, %s372_s10  }
   0x8   :  { %s22_s12 = sshll.u32 %s373_s11, 4  ;;  %s374_s13 = smov 32   ;;  %s23_s12 = int_to_ptr.vmem [resolvable:$true] %s22_s12 }
   0x9   :  { %s375_s14 = smov 2   ;;  %s48_s16 = sshll.u32 %s452_s3, 4  ;;  %s49_s16 = int_to_ptr.hbm [resolvable:$true] %s48_s16 }
   0xa   :  { %28 = dma.hbm_to_vmem [thread:$0]  %s21_s8, 32, %s23_s12, [#allocation3], %s374_s13, %s374_s13, %s375_s14  }
   0xb   :  { %s376_s17 = smov [#allocation7]   ;;  %s63_s20 = sshll.u32 %s454_s5, 4  ;;  %s64_s20 = int_to_ptr.hbm [resolvable:$true] %s63_s20 }
   0xc   :  { %s50_s0 = sshll.u32 %s376_s17, 4  ;;  %s377_s21 = smov [#allocation8]   ;;  %s51_s0 = int_to_ptr.vmem [resolvable:$true] %s50_s0 }
   0xd   :  { %56 = dma.hbm_to_vmem [thread:$0]  %s49_s16, 2048, %s51_s0, [#allocation6], %s371_s9, %s371_s9, %s372_s10  }
   0xe   :  { %s65_s22 = sshll.u32 %s377_s21, 4  ;;  %s66_s22 = int_to_ptr.vmem [resolvable:$true] %s65_s22 }
   0xf   :  { %71 = dma.hbm_to_vmem [thread:$0]  %s64_s20, 2048, %s66_s22, [#allocation9], %s371_s9, %s371_s9, %s372_s10  }
  0x10   :  { %362 = dma.done.wait [#allocation3], 128  }
  0x11   :  { %363 = vsyncadd [#allocation3], 4294967168 }
  0x12   :  { %364 = dma.done.wait [#allocation6], 2304  }
  0x13   :  { %365 = vsyncadd [#allocation6], 4294964992 }
  0x14   :  { %366 = dma.done.wait [#allocation9], 2048  }
  0x15   :  { %367 = vsyncadd [#allocation9], 4294965248  ;;  %v92_v0 = vld [vmem:[#allocation5 + $0x8] sm:$0xff]  ;;  %v91_v1 = vld [vmem:[#allocation5] sm:$0xff]  ;;  %vm97_vm0 = vcmask 130048  }
  0x16   :  { %115 = vmatpush.msra.mxu0 %v92_v0  ;;  %v90_v2 = vld [vmem:[#allocation2] sm:$0xff]  ;;  %v137_v3 = vld [vmem:[#allocation7 + $0x78] sm:$0xff]  ;;  %v136_v4 = vld [vmem:[#allocation7 + $0x70] sm:$0xff] }
  0x17   :  { %142 = vmatpush.msra.mxu1 %v137_v3  ;;  %v135_v5 = vld [vmem:[#allocation7 + $0x68] sm:$0xff]  ;;  %v134_v6 = vld [vmem:[#allocation7 + $0x60] sm:$0xff]  ;;  %v133_v7 = vld [vmem:[#allocation7 + $0x58] sm:$0xff] }
  0x18   :  { %116 = vmatpush.msra.mxu0 %v91_v1  ;;  %v132_v8 = vld [vmem:[#allocation7 + $0x50] sm:$0xff]  ;;  %v131_v9 = vld [vmem:[#allocation7 + $0x48] sm:$0xff]  ;;  %v130_v10 = vld [vmem:[#allocation7 + $0x40] sm:$0xff] }
  0x19   :  { %225 = vmatmul.msk.f32.vlgmr.msra.gmra.mxu0 %vm97_vm0, %v90_v2  ;;  %143 = vmatpush.msra.mxu1 %v136_v4  ;;  %v129_v11 = vld [vmem:[#allocation7 + $0x38] sm:$0xff]  ;;  %v128_v12 = vld [vmem:[#allocation7 + $0x30] sm:$0xff]  ;;  %v127_v13 = vld [vmem:[#allocation7 + $0x28] sm:$0xff] }
  0x1a   :  { %v126_v14 = vld [vmem:[#allocation7 + $0x20] sm:$0xff]  ;;  %v125_v15 = vld [vmem:[#allocation7 + $0x18] sm:$0xff]  ;;  %v124_v16 = vld [vmem:[#allocation7 + $0x10] sm:$0xff] }
  0x1b   :  { %144 = vmatpush.msra.mxu1 %v135_v5  ;;  %v123_v17 = vld [vmem:[#allocation7 + $0x8] sm:$0xff]  ;;  %v122_v18 = vld [vmem:[#allocation7] sm:$0xff]  ;;  %v178_v19 = vld [vmem:[#allocation8 + $0x78] sm:$0xff] }
  0x1c   :  { %v177_v20 = vld [vmem:[#allocation8 + $0x70] sm:$0xff]  ;;  %183 = vmatpush.msra.mxu2 %v178_v19  ;;  %v176_v21 = vld [vmem:[#allocation8 + $0x68] sm:$0xff]  ;;  %v175_v22 = vld [vmem:[#allocation8 + $0x60] sm:$0xff] }
  0x1d   :  { %145 = vmatpush.msra.mxu1 %v134_v6  ;;  %v174_v23 = vld [vmem:[#allocation8 + $0x58] sm:$0xff]  ;;  %v173_v24 = vld [vmem:[#allocation8 + $0x50] sm:$0xff]  ;;  %v172_v25 = vld [vmem:[#allocation8 + $0x48] sm:$0xff] }
  0x1e   :  { %184 = vmatpush.msra.mxu2 %v177_v20  ;;  %v171_v26 = vld [vmem:[#allocation8 + $0x40] sm:$0xff]  ;;  %v170_v27 = vld [vmem:[#allocation8 + $0x38] sm:$0xff]  ;;  %v169_v28 = vld [vmem:[#allocation8 + $0x30] sm:$0xff] }
  0x1f   :  { %146 = vmatpush.msra.mxu1 %v133_v7  ;;  %v168_v29 = vld [vmem:[#allocation8 + $0x28] sm:$0xff]  ;;  %v167_v34 = vld [vmem:[#allocation8 + $0x20] sm:$0xff]  ;;  %v166_v35 = vld [vmem:[#allocation8 + $0x18] sm:$0xff] }
  0x20   :  { %185 = vmatpush.msra.mxu2 %v176_v21  ;;  %v235_v30 = vld [vmem:[%s451_s2] ss:$0 sm:$0xff]  ;;  %v165_v36 = vld [vmem:[#allocation8 + $0x10] sm:$0xff]  ;;  %v163_v38 = vld [vmem:[#allocation8] sm:$0xff] }
  0x21   :  { %147 = vmatpush.msra.mxu1 %v132_v8  ;;  %v164_v37 = vld [vmem:[#allocation8 + $0x8] sm:$0xff] }
  0x22   :  { %186 = vmatpush.msra.mxu2 %v175_v22  ;;  %v236_v39 = vld [vmem:[%s453_s4] ss:$0 sm:$0xff] }
  0x23   :  { %148 = vmatpush.msra.mxu1 %v131_v9  ;;  %v237_v43 = vld [vmem:[%s455_s6] ss:$0 sm:$0xff] }
  0x24   :  { %187 = vmatpush.msra.mxu2 %v174_v23 }
  0x25   :  { %149 = vmatpush.msra.mxu1 %v130_v10 }
  0x26   :  { %188 = vmatpush.msra.mxu2 %v173_v24 }
  0x27   :  { %150 = vmatpush.msra.mxu1 %v129_v11 }
  0x28   :  { %189 = vmatpush.msra.mxu2 %v172_v25 }
  0x29   :  { %151 = vmatpush.msra.mxu1 %v128_v12 }
  0x2a   :  { %190 = vmatpush.msra.mxu2 %v171_v26 }
  0x2b   :  { %152 = vmatpush.msra.mxu1 %v127_v13 }
  0x2c   :  { %191 = vmatpush.msra.mxu2 %v170_v27 }
  0x2d   :  { %153 = vmatpush.msra.mxu1 %v126_v14 }
  0x2e   :  { %192 = vmatpush.msra.mxu2 %v169_v28 }
  0x2f   :  { %154 = vmatpush.msra.mxu1 %v125_v15 }
  0x30   :  { %193 = vmatpush.msra.mxu2 %v168_v29 }
  0x31   :  { %155 = vmatpush.msra.mxu1 %v124_v16 }
  0x32   :  { %194 = vmatpush.msra.mxu2 %v167_v34 }
  0x33   :  { %156 = vmatpush.msra.mxu1 %v123_v17 }
  0x34   :  { %195 = vmatpush.msra.mxu2 %v166_v35 }
  0x35   :  { %157 = vmatpush.msra.mxu1 %v122_v18 }
  0x36   :  { %196 = vmatpush.msra.mxu2 %v165_v36 }
  0x38   :  { %197 = vmatpush.msra.mxu2 %v164_v37 }
  0x3a   :  { %198 = vmatpush.msra.mxu2 %v163_v38 }
  0x96   :  { %v118_v31 = vpop.f32.mrf.mxu0 }
  0x97   :  { %v119_v32 = vadd.f32 %v235_v30, %v118_v31 }
  0x99   :  { %238 = vtanh.f32 %v119_v32 }
  0x9f   :  { %v239_v33 = vpop.eup %238 }
  0xa0   :  { %158 = vmatmul.f32.vlgmr.msra.gmra.mxu1 %v239_v33 }
 0x11d   :  { %v159_v40 = vpop.f32.mrf.mxu1 }
 0x11e   :  { %v160_v41 = vadd.f32 %v236_v39, %v159_v40 }
 0x120   :  { %240 = vtanh.f32 %v160_v41 }
 0x126   :  { %v241_v42 = vpop.eup %240 }
 0x127   :  { %199 = vmatmul.f32.vlgmr.msra.gmra.mxu2 %v241_v42 }
 0x1aa   :  { %v200_v44 = vpop.f32.mrf.mxu2 }
 0x1ab   :  { %v201_v45 = vadd.f32 %v237_v43, %v200_v44 }
 0x1ad   :  { %203 = vst [vmem:[#allocation10] sm:$0xff] %v201_v45 }
 0x1ae   :  { %207 = vsyncadd [#allocation4], 96  ;;  %s210_s28 = sshll.u32 %s456_s7, 4  ;;  %s378_s29 = smov [#allocation10]   ;;  %s211_s28 = int_to_ptr.hbm [resolvable:$true] %s210_s28 }
 0x1af   :  { %s208_s30 = sshll.u32 %s378_s29, 4  ;;  %s209_s30 = int_to_ptr.vmem [resolvable:$true] %s208_s30 }
 0x1b0   :  { %216 = dma.vmem_to_hbm [thread:$0]  %s209_s30, 32, %s211_s28, [#allocation4], %s374_s13, %s374_s13, %s375_s14  }
 0x1b1   :  { %368 = dma.done.wait [#allocation4], 128  }
 0x1b2   :  { %369 = vsyncadd [#allocation4], 4294967168 }
 0x1b3   :  { %221 = vsyncpa [#allocation3], 1 }
 0x1b4   :  { %222 = vsyncpa [#allocation6], 1 }
 0x1b5   :  { %223 = vsyncpa [#allocation9], 1 }
 0x1b6   :  { %224 = vsyncpa [#allocation4], 1 }

</bundles_post_ra>
